<compile_context>
chip_gen: v6e
topology: v6e:2x2x1
jax: 0.10.0
libtpu: 0.0.40
codegen_flags: <defaults>
</compile_context>

<pallas_src>
import jax
import jax.numpy as jnp
from jax.experimental import pallas as pl
from jax.experimental.pallas import tpu as pltpu

# Net.__init__ uses len(FEATURES) as the input width; FEATURES is external to
# the snippet, so we pick a small deterministic value here.
NUM_FEATURES = 32
F_PAD = 128          # features zero-padded to a lane-dense 128
H1 = 512
H2 = 256
OUT = 256


def _round_up(n, m):
    return ((n + m - 1) // m) * m


def mlp_kernel(x_ref, w1_ref, b1_ref, w2_ref, b2_ref, w3_ref, b3_ref, o_ref):
    # One batch tile: Linear -> ReLU -> Linear -> ReLU -> Linear, fully fused.
    # bf16 operands into the MXU, f32 accumulation, f32 bias/ReLU epilogue.
    x = x_ref[...].astype(jnp.bfloat16)
    h1 = jnp.dot(x, w1_ref[...], preferred_element_type=jnp.float32) + b1_ref[...]
    h1 = jnp.maximum(h1, 0.0).astype(jnp.bfloat16)
    h2 = jnp.dot(h1, w2_ref[...], preferred_element_type=jnp.float32) + b2_ref[...]
    h2 = jnp.maximum(h2, 0.0).astype(jnp.bfloat16)
    o_ref[...] = (
        jnp.dot(h2, w3_ref[...], preferred_element_type=jnp.float32) + b3_ref[...]
    ).astype(o_ref.dtype)


def net_forward(x, params, *, tm=512, out_dtype=jnp.float32):
    """x: (B, NUM_FEATURES) float32.

    params: dict from prepare_params() -- bf16 weights (in,out), w1 row-padded
    to F_PAD, f32 biases (1,out).
    """
    B = x.shape[0]
    # Lane-dense feature padding (32 -> 128); zero rows of w1 make it exact.
    x = jnp.pad(x, ((0, 0), (0, F_PAD - x.shape[1])))

    # Batch tiling: biggest tile up to `tm`, multiple of 8.  If the batch
    # spans multiple tiles, force an even tile count (shrink TM, not pad) so
    # the "parallel" grid axis balances across v7x's two TensorCores.
    Bp8 = _round_up(B, 8)
    if Bp8 <= tm:
        n_tiles = 1
        TM = Bp8
    else:
        n_tiles = int(pl.cdiv(Bp8, tm))
        if n_tiles % 2:
            n_tiles += 1
        TM = _round_up(int(pl.cdiv(Bp8, n_tiles)), 8)
    Bp = TM * n_tiles
    if Bp != B:
        x = jnp.pad(x, ((0, Bp - B), (0, 0)))

    w1, b1 = params["w1"], params["b1"]
    w2, b2 = params["w2"], params["b2"]
    w3, b3 = params["w3"], params["b3"]

    out_bytes = jnp.dtype(out_dtype).itemsize
    flops = 2 * Bp * (F_PAD * H1 + H1 * H2 + H2 * OUT)
    bytes_accessed = (
        Bp * F_PAD * 4                                      # x (f32, padded)
        + (F_PAD * H1 + H1 * H2 + H2 * OUT) * 2             # bf16 weights
        + (H1 + H2 + OUT) * 4                               # f32 biases
        + Bp * OUT * out_bytes                              # output
    )

    out = pl.pallas_call(
        mlp_kernel,
        out_shape=jax.ShapeDtypeStruct((Bp, OUT), out_dtype),
        grid=(n_tiles,),
        in_specs=[
            pl.BlockSpec((TM, F_PAD), lambda i: (i, 0)),    # x: tiled over batch
            pl.BlockSpec((F_PAD, H1), lambda i: (0, 0)),    # weights/biases are
            pl.BlockSpec((1, H1), lambda i: (0, 0)),        # VMEM-resident across
            pl.BlockSpec((H1, H2), lambda i: (0, 0)),       # all grid steps
            pl.BlockSpec((1, H2), lambda i: (0, 0)),
            pl.BlockSpec((H2, OUT), lambda i: (0, 0)),
            pl.BlockSpec((1, OUT), lambda i: (0, 0)),
        ],
        out_specs=pl.BlockSpec((TM, OUT), lambda i: (i, 0)),
        compiler_params=pltpu.CompilerParams(
            # Batch tiles are independent -> shard across TensorCores on v7x.
            dimension_semantics=("parallel",),
            # Large batch tiles + f32 intermediates can exceed v5e's 16 MiB
            # default scoped-VMEM limit; 48 MiB is safe on v5e/v6e/v7x.
            vmem_limit_bytes=48 * 1024 * 1024,
        ),
        cost_estimate=pl.CostEstimate(
            flops=flops, transcendentals=0, bytes_accessed=bytes_accessed
        ),
    )(x, w1, b1, w2, b2, w3, b3)
    return out[:B]


def init_params(key):
    """Deterministic PyTorch-Linear-style init: U(-1/sqrt(fan_in), 1/sqrt(fan_in)). f32."""
    ks = jax.random.split(key, 6)

    def linear(kw, kb, fan_in, fan_out):
        bound = 1.0 / jnp.sqrt(fan_in)
        # PyTorch stores (out, in); transpose to (in, out) for x @ W.
        w = jax.random.uniform(kw, (fan_out, fan_in), jnp.float32, -bound, bound).T
        b = jax.random.uniform(kb, (1, fan_out), jnp.float32, -bound, bound)
        return w, b

    w1, b1 = linear(ks[0], ks[1], NUM_FEATURES, H1)
    w2, b2 = linear(ks[2], ks[3], H1, H2)
    w3, b3 = linear(ks[4], ks[5], H2, OUT)
    return dict(w1=w1, b1=b1, w2=w2, b2=b2, w3=w3, b3=b3)


def prepare_params(params_f32):
    """One-time host prep: bf16 weights (half DMA, 2x MXU rate), w1 rows zero-padded
    to F_PAD for a lane-dense first matmul, f32 biases."""
    w1 = params_f32["w1"].astype(jnp.bfloat16)
    w1 = jnp.pad(w1, ((0, F_PAD - w1.shape[0]), (0, 0)))
    return dict(
        w1=w1, b1=params_f32["b1"],
        w2=params_f32["w2"].astype(jnp.bfloat16), b2=params_f32["b2"],
        w3=params_f32["w3"].astype(jnp.bfloat16), b3=params_f32["b3"],
    )


def net_forward_ref(x, p):
    """Pure-JAX reference. Mirrors the kernel's mixed precision when given bf16 weights.
    Works with either raw f32 params or prepared (bf16, row-padded w1) params."""
    dt = p["w1"].dtype
    w1 = p["w1"][: x.shape[1], :]   # drop zero feature padding if present
    h1 = jnp.maximum(
        jnp.dot(x.astype(dt), w1, preferred_element_type=jnp.float32) + p["b1"], 0.0)
    h2 = jnp.maximum(
        jnp.dot(h1.astype(dt), p["w2"], preferred_element_type=jnp.float32) + p["b2"], 0.0)
    return jnp.dot(h2.astype(dt), p["w3"], preferred_element_type=jnp.float32) + p["b3"]


if __name__ == "__main__":
    key = jax.random.PRNGKey(0)
    k_param, k_x, k_x2 = jax.random.split(key, 3)
    params_f32 = init_params(k_param)
    params = prepare_params(params_f32)

    # Small batch (matches the original demo shape) -> single tile.
    B = 8
    x = jax.random.normal(k_x, (B, NUM_FEATURES), jnp.float32)
    out = jax.block_until_ready(net_forward(x, params))
    assert out.shape == (B, OUT)

    # Tight check vs a reference using the same bf16-weight / f32-accumulate recipe.
    ref_mixed = net_forward_ref(x, params)
    assert jnp.allclose(out, ref_mixed, atol=1e-3, rtol=1e-3), "mismatch vs mixed-precision ref"
    # Loose check vs the pure-f32 PyTorch-style reference (bf16 weight quantization error).
    ref_f32 = net_forward_ref(x, params_f32)
    assert jnp.allclose(out, ref_f32, atol=5e-2, rtol=5e-2), "mismatch vs f32 ref"

    # Larger non-multiple batch: exercises feature/batch padding and the
    # even-tile-count path (1200 -> 4 tiles of 304 rows).
    B2 = 1200
    x2 = jax.random.normal(k_x2, (B2, NUM_FEATURES), jnp.float32)
    out2 = jax.block_until_ready(net_forward(x2, params))
    assert out2.shape == (B2, OUT)
    ref2 = net_forward_ref(x2, params)
    assert jnp.allclose(out2, ref2, atol=1e-3, rtol=1e-3), \
        "mismatch vs mixed-precision ref (tiled batch)"

    # Optional bf16 output path (halves HBM writeback on mem-bound v6e).
    out3 = jax.block_until_ready(net_forward(x2, params, out_dtype=jnp.bfloat16))
    assert out3.dtype == jnp.bfloat16 and out3.shape == (B2, OUT)
    assert jnp.allclose(out3.astype(jnp.float32), ref2, atol=2e-2, rtol=2e-2), \
        "mismatch vs mixed-precision ref (bf16 output)"

    # NOTE: if this forward is called repeatedly with tiny batches (per-token
    # inference), fold calls into one larger batch (as above) so the ~450 KiB
    # of bf16 weights is DMA'd once per call instead of once per tiny batch;
    # a cross-call persistent-VMEM weight prefetch is the further step if
    # batching is impossible.
    print("KERNEL_OK")
</pallas_src>

<mosaic_0001>
module attributes {stable_mosaic.version = 11 : i64} {
  func.func @mlp_kernel(%arg0: i32, %arg1: memref<8x128xf32, #tpu.memory_space<vmem>>, %arg2: memref<128x512xbf16, #tpu.memory_space<vmem>>, %arg3: memref<1x512xf32, #tpu.memory_space<vmem>>, %arg4: memref<512x256xbf16, #tpu.memory_space<vmem>>, %arg5: memref<1x256xf32, #tpu.memory_space<vmem>>, %arg6: memref<256x256xbf16, #tpu.memory_space<vmem>>, %arg7: memref<1x256xf32, #tpu.memory_space<vmem>>, %arg8: memref<8x256xf32, #tpu.memory_space<vmem>>) attributes {dimension_semantics = [#tpu.dimension_semantics<parallel>], iteration_bounds = array<i64: 1>, scalar_prefetch = 0 : i64, scratch_operands = 0 : i64, tpu.core_type = #tpu.core_type<tc>, window_params = [{transform_indices = @transform_0, window_bounds = array<i64: 8, 128>}, {pipeline_mode = #tpu.pipeline_mode<synchronous>, transform_indices = @transform_1, window_bounds = array<i64: 128, 512>}, {pipeline_mode = #tpu.pipeline_mode<synchronous>, transform_indices = @transform_2, window_bounds = array<i64: 1, 512>}, {pipeline_mode = #tpu.pipeline_mode<synchronous>, transform_indices = @transform_3, window_bounds = array<i64: 512, 256>}, {pipeline_mode = #tpu.pipeline_mode<synchronous>, transform_indices = @transform_4, window_bounds = array<i64: 1, 256>}, {pipeline_mode = #tpu.pipeline_mode<synchronous>, transform_indices = @transform_5, window_bounds = array<i64: 256, 256>}, {pipeline_mode = #tpu.pipeline_mode<synchronous>, transform_indices = @transform_6, window_bounds = array<i64: 1, 256>}, {transform_indices = @transform_7, window_bounds = array<i64: 8, 256>}]} {
    %c0 = arith.constant 0 : index
    %c0_0 = arith.constant 0 : index
    %0 = vector.load %arg1[%c0, %c0_0] : memref<8x128xf32, #tpu.memory_space<vmem>>, vector<8x128xf32>
    %1 = arith.truncf %0 : vector<8x128xf32> to vector<8x128xbf16>
    %c0_1 = arith.constant 0 : index
    %c0_2 = arith.constant 0 : index
    %2 = vector.load %arg2[%c0_1, %c0_2] : memref<128x512xbf16, #tpu.memory_space<vmem>>, vector<128x512xbf16>
    %cst = arith.constant dense<0.000000e+00> : vector<8x512xf32>
    %3 = tpu.matmul %1, %2, %cst {dimension_numbers = #tpu.dot_dimension_numbers<[1], [0], [0], [1], [0, 0, 1, 1], [], []>} : vector<8x128xbf16>, vector<128x512xbf16>, vector<8x512xf32> -> vector<8x512xf32>
    %c0_3 = arith.constant 0 : index
    %c0_4 = arith.constant 0 : index
    %4 = vector.load %arg3[%c0_3, %c0_4] : memref<1x512xf32, #tpu.memory_space<vmem>>, vector<1x512xf32>
    %5 = vector.broadcast %4 : vector<1x512xf32> to vector<8x512xf32>
    %6 = arith.addf %3, %5 : vector<8x512xf32>
    %cst_5 = arith.constant 0.000000e+00 : f32
    %7 = vector.broadcast %cst_5 : f32 to vector<8x512xf32>
    %8 = arith.maximumf %6, %7 : vector<8x512xf32>
    %9 = arith.truncf %8 : vector<8x512xf32> to vector<8x512xbf16>
    %c0_6 = arith.constant 0 : index
    %c0_7 = arith.constant 0 : index
    %10 = vector.load %arg4[%c0_6, %c0_7] : memref<512x256xbf16, #tpu.memory_space<vmem>>, vector<512x256xbf16>
    %cst_8 = arith.constant dense<0.000000e+00> : vector<8x256xf32>
    %11 = tpu.matmul %9, %10, %cst_8 {dimension_numbers = #tpu.dot_dimension_numbers<[1], [0], [0], [1], [0, 0, 1, 1], [], []>} : vector<8x512xbf16>, vector<512x256xbf16>, vector<8x256xf32> -> vector<8x256xf32>
    %c0_9 = arith.constant 0 : index
    %c0_10 = arith.constant 0 : index
    %12 = vector.load %arg5[%c0_9, %c0_10] : memref<1x256xf32, #tpu.memory_space<vmem>>, vector<1x256xf32>
    %13 = vector.broadcast %12 : vector<1x256xf32> to vector<8x256xf32>
    %14 = arith.addf %11, %13 : vector<8x256xf32>
    %cst_11 = arith.constant 0.000000e+00 : f32
    %15 = vector.broadcast %cst_11 : f32 to vector<8x256xf32>
    %16 = arith.maximumf %14, %15 : vector<8x256xf32>
    %17 = arith.truncf %16 : vector<8x256xf32> to vector<8x256xbf16>
    %c0_12 = arith.constant 0 : index
    %c0_13 = arith.constant 0 : index
    %18 = vector.load %arg6[%c0_12, %c0_13] : memref<256x256xbf16, #tpu.memory_space<vmem>>, vector<256x256xbf16>
    %cst_14 = arith.constant dense<0.000000e+00> : vector<8x256xf32>
    %19 = tpu.matmul %17, %18, %cst_14 {dimension_numbers = #tpu.dot_dimension_numbers<[1], [0], [0], [1], [0, 0, 1, 1], [], []>} : vector<8x256xbf16>, vector<256x256xbf16>, vector<8x256xf32> -> vector<8x256xf32>
    %c0_15 = arith.constant 0 : index
    %c0_16 = arith.constant 0 : index
    %20 = vector.load %arg7[%c0_15, %c0_16] : memref<1x256xf32, #tpu.memory_space<vmem>>, vector<1x256xf32>
    %21 = vector.broadcast %20 : vector<1x256xf32> to vector<8x256xf32>
    %22 = arith.addf %19, %21 : vector<8x256xf32>
    %c0_17 = arith.constant 0 : index
    %c0_18 = arith.constant 0 : index
    %23 = vector.load %arg8[%c0_17, %c0_18] : memref<8x256xf32, #tpu.memory_space<vmem>>, vector<8x256xf32>
    tpu.vector_store %arg8[%c0_17, %c0_18], %22 {strides = array<i32>} : memref<8x256xf32, #tpu.memory_space<vmem>>, vector<8x256xf32>,
    return
  }
  func.func @transform_0(%arg0: i32) -> (i32, i32) {
    %c0_i32 = arith.constant 0 : i32
    %c0_i32_0 = arith.constant 0 : i32
    return %arg0, %c0_i32 : i32, i32
  }
  func.func @transform_1(%arg0: i32) -> (i32, i32) {
    %c0_i32 = arith.constant 0 : i32
    %c0_i32_0 = arith.constant 0 : i32
    %c0_i32_1 = arith.constant 0 : i32
    return %c0_i32, %c0_i32_0 : i32, i32
  }
  func.func @transform_2(%arg0: i32) -> (i32, i32) {
    %c0_i32 = arith.constant 0 : i32
    %c0_i32_0 = arith.constant 0 : i32
    %c0_i32_1 = arith.constant 0 : i32
    return %c0_i32, %c0_i32_0 : i32, i32
  }
  func.func @transform_3(%arg0: i32) -> (i32, i32) {
    %c0_i32 = arith.constant 0 : i32
    %c0_i32_0 = arith.constant 0 : i32
    %c0_i32_1 = arith.constant 0 : i32
    return %c0_i32, %c0_i32_0 : i32, i32
  }
  func.func @transform_4(%arg0: i32) -> (i32, i32) {
    %c0_i32 = arith.constant 0 : i32
    %c0_i32_0 = arith.constant 0 : i32
    %c0_i32_1 = arith.constant 0 : i32
    return %c0_i32, %c0_i32_0 : i32, i32
  }
  func.func @transform_5(%arg0: i32) -> (i32, i32) {
    %c0_i32 = arith.constant 0 : i32
    %c0_i32_0 = arith.constant 0 : i32
    %c0_i32_1 = arith.constant 0 : i32
    return %c0_i32, %c0_i32_0 : i32, i32
  }
  func.func @transform_6(%arg0: i32) -> (i32, i32) {
    %c0_i32 = arith.constant 0 : i32
    %c0_i32_0 = arith.constant 0 : i32
    %c0_i32_1 = arith.constant 0 : i32
    return %c0_i32, %c0_i32_0 : i32, i32
  }
  func.func @transform_7(%arg0: i32) -> (i32, i32) {
    %c0_i32 = arith.constant 0 : i32
    %c0_i32_0 = arith.constant 0 : i32
    return %arg0, %c0_i32 : i32, i32
  }
}

</mosaic_0001>

<bundles_post_ra>
// kernel: tpu_custom_call.1
= control target key start
LH: loop header
LB: loop body
LE: loop exit
PB: predicated region body
PF: predicated region fallthrough
CT: control target
= control target key end

     0   :  { %12 = vsyncpa [#allocation3], 0  ;;  %s1698_s0 = inlined_call_operand.hbm [shape: f32[8,128], index: 0, kind: input, shape index: {}]   ;;  %s1699_s1 = inlined_call_operand.hbm [shape: bf16[128,512], index: 1, kind: input, shape index: {}]   ;;  %s1700_s2 = inlined_call_operand.hbm [shape: f32[1,512], index: 2, kind: input, shape index: {}]   ;;  %s1701_s3 = inlined_call_operand.hbm [shape: bf16[512,256], index: 3, kind: input, shape index: {}]   ;;  %s1702_s4 = inlined_call_operand.vmem [shape: f32[1,256], index: 4, kind: input, shape index: {}]   ;;  %s1703_s5 = inlined_call_operand.hbm [shape: bf16[256,256], index: 5, kind: input, shape index: {}]   ;;  %s1704_s6 = inlined_call_operand.vmem [shape: f32[1,256], index: 6, kind: input, shape index: {}]   ;;  %s1705_s7 = inlined_call_operand.hbm [shape: f32[8,256], index: 7, kind: output, shape index: {}]  }
   0x1   :  { %13 = vsyncpa [#allocation6], 0 }
   0x2   :  { %14 = vsyncpa [#allocation9], 0 }
   0x3   :  { %15 = vsyncpa [#allocation4], 0  ;;  %s1603_s24 = smov [#allocation5]  }
   0x4   :  { %s31_s25 = sshll.u32 %s1603_s24, 4  ;;  %s32_s25 = int_to_ptr.vmem [resolvable:$true] %s31_s25 }
   0x5   :  { %s1483_s26 = scalar_lea.vmem %s32_s25, 4096  ;;  %p1488_p1 = scmp.lt.s32.totalorder %s32_s25, %s32_s25 }
   0x6   :  { %p1484_p0 = scmp.ne.s32.totalorder %s32_s25, %s1483_s26  ;;  %p1489_p2 = scmp.lt.s32.totalorder %s1483_s26, %s1483_s26 }
   0x8   :  { %p1490_p3 = por %p1489_p2, %p1488_p1 }
   0xa   :  { %p1491_p4 = pnand %p1490_p3, %p1484_p0 }
   0xc   :  { %1494 = shalt.err (!%p1491_p4)
}
   0xd   :  { %s1604_s27 = smov 256   ;;  %s1605_s28 = smov 16  }
   0xe   :  { %37 = dma.hbm_to_vmem [thread:$0]  %s1699_s1, 4096, %s32_s25, [#allocation6], %s1604_s27, %s1604_s27, %s1605_s28  }
   0xf   :  { %s1606_s8 = smov [#allocation8]  }
  0x10   :  { %s53_s9 = sshll.u32 %s1606_s8, 4  ;;  %s54_s9 = int_to_ptr.vmem [resolvable:$true] %s53_s9 }
  0x11   :  { %s1503_s10 = scalar_lea.vmem %s54_s9, 8192  ;;  %p1508_p6 = scmp.lt.s32.totalorder %s54_s9, %s54_s9 }
  0x12   :  { %p1504_p5 = scmp.ne.s32.totalorder %s54_s9, %s1503_s10  ;;  %p1509_p7 = scmp.lt.s32.totalorder %s1503_s10, %s1503_s10 }
  0x14   :  { %p1510_p8 = por %p1509_p7, %p1508_p6 }
  0x16   :  { %p1511_p9 = pnand %p1510_p8, %p1504_p5 }
  0x18   :  { %1514 = shalt.err (!%p1511_p9)
}
  0x19   :  { %s1607_s11 = smov 128   ;;  %s1608_s12 = smov 8  }
  0x1a   :  { %59 = dma.hbm_to_vmem [thread:$0]  %s1701_s3, 8192, %s54_s9, [#allocation9], %s1607_s11, %s1607_s11, %s1608_s12  }
  0x1b   :  { %s1609_s1 = smov [#allocation2]   ;;  %s1610_s16 = smov [#allocation7]  }
  0x1c   :  { %s22_s15 = sshll.u32 %s1609_s1, 4  ;;  %s44_s17 = sshll.u32 %s1610_s16, 4  ;;  %s23_s15 = int_to_ptr.vmem [resolvable:$true] %s22_s15  ;;  %s45_s17 = int_to_ptr.vmem [resolvable:$true] %s44_s17 }
  0x1d   :  { %s1523_s18 = scalar_lea.vmem %s23_s15, 128  ;;  %p1528_p11 = scmp.lt.s32.totalorder %s23_s15, %s23_s15 }
  0x1e   :  { %p1524_p10 = scmp.ne.s32.totalorder %s23_s15, %s1523_s18  ;;  %p1529_p12 = scmp.lt.s32.totalorder %s1523_s18, %s1523_s18 }
  0x20   :  { %p1530_p13 = por %p1529_p12, %p1528_p11 }
  0x22   :  { %p1531_p0 = pnand %p1530_p13, %p1524_p10 }
  0x24   :  { %1534 = shalt.err (!%p1531_p0)
}
  0x25   :  { %25 = dma.hbm_to_vmem [thread:$0]  %s1698_s0, 128, %s23_s15, [#allocation3]  }
  0x26   :  { %s1543_s21 = scalar_lea.vmem %s45_s17, 64  ;;  %p1548_p2 = scmp.lt.s32.totalorder %s45_s17, %s45_s17 }
  0x27   :  { %p1544_p1 = scmp.ne.s32.totalorder %s45_s17, %s1543_s21  ;;  %p1549_p3 = scmp.lt.s32.totalorder %s1543_s21, %s1543_s21 }
  0x29   :  { %p1550_p4 = por %p1549_p3, %p1548_p2 }
  0x2b   :  { %p1551_p5 = pnand %p1550_p4, %p1544_p1 }
  0x2d   :  { %1554 = shalt.err (!%p1551_p5)
}
  0x2e   :  { %47 = dma.hbm_to_vmem [thread:$0]  %s1700_s2, 64, %s45_s17, [#allocation6]  }
  0x2f   :  { %s1611_s23 = smov [#allocation10]  }
  0x30   :  { %s67_s24 = sshll.u32 %s1611_s23, 4  ;;  %s68_s24 = int_to_ptr.vmem [resolvable:$true] %s67_s24 }
  0x31   :  { %s1563_s25 = scalar_lea.vmem %s68_s24, 4096  ;;  %p1568_p7 = scmp.lt.s32.totalorder %s68_s24, %s68_s24 }
  0x32   :  { %p1564_p6 = scmp.ne.s32.totalorder %s68_s24, %s1563_s25  ;;  %p1569_p8 = scmp.lt.s32.totalorder %s1563_s25, %s1563_s25 }
  0x34   :  { %p1570_p9 = por %p1569_p8, %p1568_p7 }
  0x36   :  { %p1571_p10 = pnand %p1570_p9, %p1564_p6 }
  0x38   :  { %1574 = shalt.err (!%p1571_p10)
}
  0x39   :  { %73 = dma.hbm_to_vmem [thread:$0]  %s1703_s5, 4096, %s68_s24, [#allocation9], %s1607_s11, %s1607_s11, %s1608_s12  }
  0x3a   :  { %1595 = dma.done.wait [#allocation3], 128  }
  0x3b   :  { %1596 = vsyncadd [#allocation3], 4294967168 }
  0x3c   :  { %1597 = dma.done.wait [#allocation6], 4160  }
  0x3d   :  { %1598 = vsyncadd [#allocation6], 4294963136 }
  0x3e   :  { %1599 = dma.done.wait [#allocation9], 12288  }
  0x3f   :  { %1600 = vsyncadd [#allocation9], 4294955008  ;;  %v1612_v0 = vmov 0   ;;  %v1283_v1 = vld [vmem:[#allocation5 + $0xe4] ss:$16 sps:$4 sm:$0xff]   ;;  %v92_v22 = vld [vmem:[#allocation2] sm:$0xff] }
  0x40   :  { %340 = vmatprep.mubr.bf16.mxu1 %v1612_v0  ;;  %v1285_v2 = vld [vmem:[#allocation5 + $0xe0] ss:$16 sps:$4 sm:$0xff]   ;;  %308 = vmatprep.subr.bf16.mxu1 %v1283_v1  ;;  %v1286_v3 = vld [vmem:[#allocation5 + $0xc4] ss:$16 sps:$4 sm:$0xff]   ;;  %v1309_v23 = vld [vmem:[#allocation5 + $0xec] ss:$16 sps:$4 sm:$0xff]   ;;  %v1675_v25 = vpack.c.bf16 %v92_v22, %v92_v22 }
  0x41   :  { %309 = vmatpush1.bf16.msra.mxu1 %v1285_v2  ;;  %v1288_v4 = vld [vmem:[#allocation5 + $0xc0] ss:$16 sps:$4 sm:$0xff]   ;;  %v1289_v5 = vld [vmem:[#allocation5 + $0xa4] ss:$16 sps:$4 sm:$0xff]   ;;  %v1307_v27 = vld [vmem:[#allocation5 + $0xe8] ss:$16 sps:$4 sm:$0xff]  }
  0x42   :  { %310 = vmatprep.subr.bf16.mxu1 %v1286_v3  ;;  %v1291_v6 = vld [vmem:[#allocation5 + $0xa0] ss:$16 sps:$4 sm:$0xff]   ;;  %v1292_v7 = vld [vmem:[#allocation5 + $0x84] ss:$16 sps:$4 sm:$0xff]   ;;  %v1312_v28 = vld [vmem:[#allocation5 + $0xcc] ss:$16 sps:$4 sm:$0xff]  }
  0x43   :  { %v1294_v8 = vld [vmem:[#allocation5 + $0x80] ss:$16 sps:$4 sm:$0xff]   ;;  %v1295_v9 = vld [vmem:[#allocation5 + $0x64] ss:$16 sps:$4 sm:$0xff]   ;;  %v1310_v31 = vld [vmem:[#allocation5 + $0xc8] ss:$16 sps:$4 sm:$0xff]  }
  0x44   :  { %v1297_v10 = vld [vmem:[#allocation5 + $0x60] ss:$16 sps:$4 sm:$0xff]   ;;  %v1298_v11 = vld [vmem:[#allocation5 + $0x44] ss:$16 sps:$4 sm:$0xff]   ;;  %v1315_v32 = vld [vmem:[#allocation5 + $0xac] ss:$16 sps:$4 sm:$0xff]  }
  0x45   :  { %311 = vmatpush1.bf16.msra.mxu1 %v1288_v4  ;;  %v1300_v12 = vld [vmem:[#allocation5 + $0x40] ss:$16 sps:$4 sm:$0xff]   ;;  %v1301_v13 = vld [vmem:[#allocation5 + $0x24] ss:$16 sps:$4 sm:$0xff]   ;;  %v1313_v35 = vld [vmem:[#allocation5 + $0xa8] ss:$16 sps:$4 sm:$0xff]  }
  0x46   :  { %312 = vmatprep.subr.bf16.mxu1 %v1289_v5  ;;  %v1303_v14 = vld [vmem:[#allocation5 + $0x20] ss:$16 sps:$4 sm:$0xff]   ;;  %v1333_v16 = vld [vmem:[#allocation8 + $0x70] ss:$8 sps:$4 sm:$0xff]   ;;  %v1336_v19 = vld [vmem:[#allocation8 + $0x60] ss:$8 sps:$4 sm:$0xff]  }
  0x47   :  { %v1331_v15 = vld [vmem:[#allocation8 + $0x74] ss:$8 sps:$4 sm:$0xff]   ;;  %v1334_v17 = vld [vmem:[#allocation8 + $0x64] ss:$8 sps:$4 sm:$0xff]   ;;  %v1304_v18 = vld [vmem:[#allocation5 + $0x4] ss:$16 sps:$4 sm:$0xff]  }
  0x48   :  { %794 = vmatprep.subr.bf16.mxu0 %v1331_v15  ;;  %v1306_v20 = vld [vmem:[#allocation5] ss:$16 sps:$4 sm:$0xff]   ;;  %v1339_v24 = vld [vmem:[#allocation8 + $0x50] ss:$8 sps:$4 sm:$0xff]   ;;  %v1342_v29 = vld [vmem:[#allocation8 + $0x40] ss:$8 sps:$4 sm:$0xff]  }
  0x49   :  { %313 = vmatpush1.bf16.msra.mxu1 %v1291_v6  ;;  %795 = vmatpush1.bf16.msra.mxu0 %v1333_v16  ;;  %v1337_v21 = vld [vmem:[#allocation8 + $0x54] ss:$8 sps:$4 sm:$0xff]   ;;  %v1340_v26 = vld [vmem:[#allocation8 + $0x44] ss:$8 sps:$4 sm:$0xff]   ;;  %v1345_v33 = vld [vmem:[#allocation8 + $0x30] ss:$8 sps:$4 sm:$0xff]  }
  0x4a   :  { %314 = vmatprep.subr.bf16.mxu1 %v1292_v7  ;;  %796 = vmatprep.subr.bf16.mxu0 %v1334_v17  ;;  %v1343_v30 = vld [vmem:[#allocation8 + $0x34] ss:$8 sps:$4 sm:$0xff]   ;;  %v1346_v34 = vld [vmem:[#allocation8 + $0x24] ss:$8 sps:$4 sm:$0xff]   ;;  %v1318_v36 = vld [vmem:[#allocation5 + $0x8c] ss:$16 sps:$4 sm:$0xff]  }
  0x4b   :  { %v1348_v37 = vld [vmem:[#allocation8 + $0x20] ss:$8 sps:$4 sm:$0xff]   ;;  %v1349_v38 = vld [vmem:[#allocation8 + $0x14] ss:$8 sps:$4 sm:$0xff]   ;;  %v1351_v41 = vld [vmem:[#allocation8 + $0x10] ss:$8 sps:$4 sm:$0xff]  }
  0x4c   :  { %v1316_v39 = vld [vmem:[#allocation5 + $0x88] ss:$16 sps:$4 sm:$0xff]   ;;  %v1321_v40 = vld [vmem:[#allocation5 + $0x6c] ss:$16 sps:$4 sm:$0xff]   ;;  %s1613_s28 = smov [#allocation11]  }
  0x4d   :  { %315 = vmatpush1.bf16.msra.mxu1 %v1294_v8  ;;  %797 = vmatpush1.bf16.msra.mxu0 %v1336_v19  ;;  %v1352_v42 = vld [vmem:[#allocation8 + $0x4] ss:$8 sps:$4 sm:$0xff]   ;;  %v1324_v44 = vld [vmem:[#allocation5 + $0x4c] ss:$16 sps:$4 sm:$0xff]   ;;  %v1355_v46 = vld [vmem:[#allocation8 + $0xf4] ss:$8 sps:$4 sm:$0xff]  }
  0x4e   :  { %316 = vmatprep.subr.bf16.mxu1 %v1295_v9  ;;  %798 = vmatprep.subr.bf16.mxu0 %v1337_v21  ;;  %v1319_v43 = vld [vmem:[#allocation5 + $0x68] ss:$16 sps:$4 sm:$0xff]   ;;  %v1354_v45 = vld [vmem:[#allocation8] ss:$8 sps:$4 sm:$0xff]   ;;  %v1360_v49 = vld [vmem:[#allocation8 + $0xf0] ss:$8 sps:$4 sm:$0xff]  }
  0x4f   :  { %v1322_v47 = vld [vmem:[#allocation5 + $0x48] ss:$16 sps:$4 sm:$0xff]   ;;  %v1327_v48 = vld [vmem:[#allocation5 + $0x2c] ss:$16 sps:$4 sm:$0xff]   ;;  %s1133_s29 = sshll.u32 %s1613_s28, 4  ;;  %s1134_s29 = int_to_ptr.vmem [resolvable:$true] %s1133_s29 }
  0x50   :  { %v1361_v50 = vld [vmem:[#allocation8 + $0xe4] ss:$8 sps:$4 sm:$0xff]   ;;  %v1330_v52 = vld [vmem:[#allocation5 + $0xc] ss:$16 sps:$4 sm:$0xff]   ;;  %v1367_v54 = vld [vmem:[#allocation8 + $0xd4] ss:$8 sps:$4 sm:$0xff]   ;;  %p1580_p12 = scmp.lt.s32.totalorder %s1134_s29, %s1134_s29 }
  0x51   :  { %317 = vmatpush1.bf16.msra.mxu1 %v1297_v10  ;;  %799 = vmatpush1.bf16.msra.mxu0 %v1339_v24  ;;  %v1325_v51 = vld [vmem:[#allocation5 + $0x28] ss:$16 sps:$4 sm:$0xff]   ;;  %v1366_v53 = vld [vmem:[#allocation8 + $0xe0] ss:$8 sps:$4 sm:$0xff]   ;;  %v1372_v57 = vld [vmem:[#allocation8 + $0xd0] ss:$8 sps:$4 sm:$0xff]  }
  0x52   :  { %318 = vmatprep.subr.bf16.mxu1 %v1298_v11  ;;  %800 = vmatprep.subr.bf16.mxu0 %v1340_v26  ;;  %v1328_v55 = vld [vmem:[#allocation5 + $0x8] ss:$16 sps:$4 sm:$0xff]   ;;  %v1357_v59 = vld [vmem:[#allocation8 + $0x170] ss:$8 sps:$4 sm:$0xff]   ;;  %v1378_v61 = vld [vmem:[#allocation8 + $0xc0] ss:$8 sps:$4 sm:$0xff]  }
  0x53   :  { %v1359_v56 = vld [vmem:[#allocation8 + $0x174] ss:$8 sps:$4 sm:$0xff]   ;;  %v1373_v58 = vld [vmem:[#allocation8 + $0xc4] ss:$8 sps:$4 sm:$0xff]   ;;  %v1363_v63 = vld [vmem:[#allocation8 + $0x160] ss:$8 sps:$4 sm:$0xff]  }
  0x54   :  { %v1365_v60 = vld [vmem:[#allocation8 + $0x164] ss:$8 sps:$4 sm:$0xff]   ;;  %v1379_v62 = vld [vmem:[#allocation8 + $0xb4] ss:$8 sps:$4 sm:$0xff]   ;;  %v1384_v1 = vld [vmem:[#allocation8 + $0xb0] ss:$8 sps:$4 sm:$0xff]  }
  0x55   :  { %319 = vmatpush1.bf16.msra.mxu1 %v1300_v12  ;;  %801 = vmatpush1.bf16.msra.mxu0 %v1342_v29  ;;  %v1385_v2 = vld [vmem:[#allocation8 + $0xa4] ss:$8 sps:$4 sm:$0xff]   ;;  %v1369_v3 = vld [vmem:[#allocation8 + $0x150] ss:$8 sps:$4 sm:$0xff]   ;;  %v1390_v5 = vld [vmem:[#allocation8 + $0xa0] ss:$8 sps:$4 sm:$0xff]  }
  0x56   :  { %320 = vmatprep.subr.bf16.mxu1 %v1301_v13  ;;  %802 = vmatprep.subr.bf16.mxu0 %v1343_v30  ;;  %v1377_v4 = vld [vmem:[#allocation8 + $0x144] ss:$8 sps:$4 sm:$0xff]   ;;  %v1375_v6 = vld [vmem:[#allocation8 + $0x140] ss:$8 sps:$4 sm:$0xff]   ;;  %v1383_v7 = vld [vmem:[#allocation8 + $0x134] ss:$8 sps:$4 sm:$0xff]  }
  0x57   :  { %v1381_v8 = vld [vmem:[#allocation8 + $0x130] ss:$8 sps:$4 sm:$0xff]   ;;  %v1389_v9 = vld [vmem:[#allocation8 + $0x124] ss:$8 sps:$4 sm:$0xff]   ;;  %v1387_v10 = vld [vmem:[#allocation8 + $0x120] ss:$8 sps:$4 sm:$0xff]  }
  0x58   :  { %v1391_v11 = vld [vmem:[#allocation8 + $0x94] ss:$8 sps:$4 sm:$0xff]   ;;  %v1393_v13 = vld [vmem:[#allocation8 + $0x110] ss:$8 sps:$4 sm:$0xff]   ;;  %v1397_v15 = vld [vmem:[#allocation8 + $0x84] ss:$8 sps:$4 sm:$0xff]  }
  0x59   :  { %321 = vmatpush1.bf16.msra.mxu1 %v1303_v14  ;;  %803 = vmatpush1.bf16.msra.mxu0 %v1345_v33  ;;  %v1395_v12 = vld [vmem:[#allocation8 + $0x114] ss:$8 sps:$4 sm:$0xff]   ;;  %v1396_v14 = vld [vmem:[#allocation8 + $0x90] ss:$8 sps:$4 sm:$0xff]   ;;  %v1401_v16 = vld [vmem:[#allocation8 + $0x104] ss:$8 sps:$4 sm:$0xff]  }
  0x5a   :  { %322 = vmatprep.subr.bf16.mxu1 %v1304_v18  ;;  %804 = vmatprep.subr.bf16.mxu0 %v1346_v34  ;;  %v1399_v17 = vld [vmem:[#allocation8 + $0x100] ss:$8 sps:$4 sm:$0xff]   ;;  %v1405_v19 = vld [vmem:[#allocation8 + $0x1f4] ss:$8 sps:$4 sm:$0xff]   ;;  %v1408_v21 = vld [vmem:[#allocation8 + $0x1e4] ss:$8 sps:$4 sm:$0xff]  }
  0x5b   :  { %v1402_v18 = vld [vmem:[#allocation8 + $0x80] ss:$8 sps:$4 sm:$0xff]   ;;  %v1409_v24 = vld [vmem:[#allocation8 + $0x1d0] ss:$8 sps:$4 sm:$0xff]   ;;  %v1420_v29 = vld [vmem:[#allocation8 + $0x1a4] ss:$8 sps:$4 sm:$0xff]  }
  0x5c   :  { %v1406_v22 = vld [vmem:[#allocation8 + $0x1e0] ss:$8 sps:$4 sm:$0xff]   ;;  %v1426_v33 = vld [vmem:[#allocation8 + $0x184] ss:$8 sps:$4 sm:$0xff]   ;;  %s1575_s30 = scalar_lea.vmem %s1134_s29, 256 }
  0x5d   :  { %323 = vmatpush1.bf16.msra.mxu1 %v1306_v20  ;;  %805 = vmatpush1.bf16.msra.mxu0 %v1348_v37  ;;  %v1403_v20 = vld [vmem:[#allocation8 + $0x1f0] ss:$8 sps:$4 sm:$0xff]   ;;  %v1412_v26 = vld [vmem:[#allocation8 + $0x1c0] ss:$8 sps:$4 sm:$0xff]   ;;  %p1576_p11 = scmp.ne.s32.totalorder %s1134_s29, %s1575_s30  ;;  %p1581_p13 = scmp.lt.s32.totalorder %s1575_s30, %s1575_s30 }
  0x5e   :  { %349 = vmatprep.subr.bf16.mxu1 %v1309_v23  ;;  %806 = vmatprep.subr.bf16.mxu0 %v1349_v38  ;;  %v1411_v23 = vld [vmem:[#allocation8 + $0x1d4] ss:$8 sps:$4 sm:$0xff]   ;;  %v1418_v30 = vld [vmem:[#allocation8 + $0x1a0] ss:$8 sps:$4 sm:$0xff]  }
  0x5f   :  { %v1424_v34 = vld [vmem:[#allocation8 + $0x180] ss:$8 sps:$4 sm:$0xff]   ;;  %p1582_p0 = por %p1581_p13, %p1580_p12 }
  0x60   :  { %341 = vmatmul.mubr.bf16.vlgmr.msra.gmra.mxu1 %v1675_v25 }
  0x61   :  { %350 = vmatpush1.bf16.msra.mxu1 %v1307_v27  ;;  %381 = vmatprep.mubr.bf16.mxu1 %v1612_v0  ;;  %v1371_v0 = vld [vmem:[#allocation8 + $0x154] ss:$8 sps:$4 sm:$0xff]   ;;  %p1583_p1 = pnand %p1582_p0, %p1576_p11 }
  0x62   :  { %351 = vmatprep.subr.bf16.mxu1 %v1312_v28  ;;  %807 = vmatpush1.bf16.msra.mxu0 %v1351_v41  ;;  %v1417_v27 = vld [vmem:[#allocation8 + $0x1b4] ss:$8 sps:$4 sm:$0xff]   ;;  %v1415_v28 = vld [vmem:[#allocation8 + $0x1b0] ss:$8 sps:$4 sm:$0xff]  }
  0x63   :  { %808 = vmatprep.subr.bf16.mxu0 %v1352_v42 }
  0x65   :  { %352 = vmatpush1.bf16.msra.mxu1 %v1310_v31  ;;  %v1423_v31 = vld [vmem:[#allocation8 + $0x194] ss:$8 sps:$4 sm:$0xff]  }
  0x66   :  { %353 = vmatprep.subr.bf16.mxu1 %v1315_v32  ;;  %809 = vmatpush1.bf16.msra.mxu0 %v1354_v45  ;;  %v1421_v32 = vld [vmem:[#allocation8 + $0x190] ss:$8 sps:$4 sm:$0xff]  }
  0x67   :  { %810 = vmatprep.subr.bf16.mxu0 %v1355_v46 }
  0x69   :  { %354 = vmatpush1.bf16.msra.mxu1 %v1313_v35  ;;  %v1429_v35 = vld [vmem:[#allocation10 + $0x74] ss:$8 sps:$4 sm:$0xff]  }
  0x6a   :  { %355 = vmatprep.subr.bf16.mxu1 %v1318_v36  ;;  %811 = vmatpush2.bf16.msra.mxu0 %v1360_v49  ;;  %v128_v36 = vlaneseq }
  0x6b   :  { %812 = vmatprep.subr.bf16.mxu0 %v1361_v50 }
  0x6c   :  { %v129_v37 = vshrl.u32 %v128_v36, 7 }
  0x6d   :  { %356 = vmatpush1.bf16.msra.mxu1 %v1316_v39  ;;  %v126_v39 = vld [vmem:[#allocation7] sm:$0xf] }
  0x6e   :  { %357 = vmatprep.subr.bf16.mxu1 %v1321_v40  ;;  %813 = vmatpush2.bf16.msra.mxu0 %v1366_v53  ;;  %v1679_v38 = vsub.s32 0, %v129_v37  ;;  %v1681_v40 = vsub.s32 1, %v129_v37 }
  0x6f   :  { %814 = vmatprep.subr.bf16.mxu0 %v1367_v54  ;;  %v1432_v54 = vld [vmem:[#allocation10 + $0x64] ss:$8 sps:$4 sm:$0xff]  }
  0x70   :  { %v131_v41 = vrot.slane %v126_v39, %v1679_v38  ;;  %v135_v42 = vrot.slane %v126_v39, %v1681_v40 }
  0x71   :  { %358 = vmatpush1.bf16.msra.mxu1 %v1319_v43 }
  0x72   :  { %359 = vmatprep.subr.bf16.mxu1 %v1324_v44  ;;  %815 = vmatpush2.bf16.msra.mxu0 %v1372_v57  ;;  %v1433_v57 = vld [vmem:[#allocation10 + $0x50] ss:$8 sps:$4 sm:$0xff]  }
  0x73   :  { %816 = vmatprep.subr.bf16.mxu0 %v1373_v58  ;;  %v1438_v58 = vld [vmem:[#allocation10 + $0x44] ss:$8 sps:$4 sm:$0xff]  }
  0x75   :  { %360 = vmatpush1.bf16.msra.mxu1 %v1322_v47 }
  0x76   :  { %361 = vmatprep.subr.bf16.mxu1 %v1327_v48  ;;  %817 = vmatpush2.bf16.msra.mxu0 %v1378_v61  ;;  %v1439_v61 = vld [vmem:[#allocation10 + $0x30] ss:$8 sps:$4 sm:$0xff]  }
  0x77   :  { %818 = vmatprep.subr.bf16.mxu0 %v1379_v62  ;;  %v1444_v62 = vld [vmem:[#allocation10 + $0x24] ss:$8 sps:$4 sm:$0xff]  }
  0x79   :  { %362 = vmatpush1.bf16.msra.mxu1 %v1325_v51 }
  0x7a   :  { %363 = vmatprep.subr.bf16.mxu1 %v1330_v52  ;;  %819 = vmatpush2.bf16.msra.mxu0 %v1384_v1  ;;  %v1427_v52 = vld [vmem:[#allocation10 + $0x70] ss:$8 sps:$4 sm:$0xff]   ;;  %v1442_v1 = vld [vmem:[#allocation10 + $0x20] ss:$8 sps:$4 sm:$0xff]  }
  0x7b   :  { %820 = vmatprep.subr.bf16.mxu0 %v1385_v2 }
  0x7d   :  { %364 = vmatpush1.bf16.msra.mxu1 %v1328_v55  ;;  %v1430_v55 = vld [vmem:[#allocation10 + $0x60] ss:$8 sps:$4 sm:$0xff]  }
  0x7e   :  { %835 = vmatprep.subr.bf16.mxu1 %v1359_v56  ;;  %821 = vmatpush2.bf16.msra.mxu0 %v1390_v5  ;;  %v1435_v56 = vld [vmem:[#allocation10 + $0x54] ss:$8 sps:$4 sm:$0xff]  }
  0x7f   :  { %822 = vmatprep.subr.bf16.mxu0 %v1391_v11 }
  0x80   :  { %382 = vmatmul.mubr.bf16.vlgmr.msra.gmra.mxu1 %v1675_v25  ;;  %v1414_v25 = vld [vmem:[#allocation8 + $0x1c4] ss:$8 sps:$4 sm:$0xff]  }
  0x81   :  { %836 = vmatpush1.bf16.msra.mxu1 %v1357_v59  ;;  %v1436_v59 = vld [vmem:[#allocation10 + $0x40] ss:$8 sps:$4 sm:$0xff]  }
  0x82   :  { %837 = vmatprep.subr.bf16.mxu1 %v1365_v60  ;;  %823 = vmatpush2.bf16.msra.mxu0 %v1396_v14  ;;  %v1441_v60 = vld [vmem:[#allocation10 + $0x34] ss:$8 sps:$4 sm:$0xff]  }
  0x83   :  { %824 = vmatprep.subr.bf16.mxu0 %v1397_v15  ;;  %v1447_v14 = vld [vmem:[#allocation10 + $0x14] ss:$8 sps:$4 sm:$0xff]   ;;  %v1445_v15 = vld [vmem:[#allocation10 + $0x10] ss:$8 sps:$4 sm:$0xff]  }
  0x85   :  { %838 = vmatpush1.bf16.msra.mxu1 %v1363_v63  ;;  %v138_v63 = vsub.s32 2, %v129_v37 }
  0x86   :  { %839 = vmatprep.subr.bf16.mxu1 %v1371_v0  ;;  %825 = vmatpush2.bf16.msra.mxu0 %v1402_v18  ;;  %v142_v0 = vsub.s32 3, %v129_v37  ;;  %v1453_v18 = vld [vmem:[#allocation10 + $0xf4] ss:$8 sps:$4 sm:$0xff]  }
  0x87   :  { %1084 = vmatprep.subr.bf16.mxu0 %v1429_v35  ;;  %v139_v2 = vrot.slane %v126_v39, %v138_v63 }
  0x89   :  { %840 = vmatpush1.bf16.msra.mxu1 %v1369_v3  ;;  %v143_v3 = vrot.slane %v126_v39, %v142_v0  ;;  %v462_v39 = vld [vmem:[%s1702_s4] sm:$0x3] }
  0x8a   :  { %841 = vmatprep.subr.bf16.mxu1 %v1377_v4 }
  0x8d   :  { %842 = vmatpush1.bf16.msra.mxu1 %v1375_v6 }
  0x8e   :  { %843 = vmatprep.subr.bf16.mxu1 %v1383_v7 }
  0x91   :  { %844 = vmatpush1.bf16.msra.mxu1 %v1381_v8 }
  0x92   :  { %845 = vmatprep.subr.bf16.mxu1 %v1389_v9 }
  0x95   :  { %846 = vmatpush1.bf16.msra.mxu1 %v1387_v10 }
  0x96   :  { %847 = vmatprep.subr.bf16.mxu1 %v1395_v12 }
  0x99   :  { %848 = vmatpush1.bf16.msra.mxu1 %v1393_v13 }
  0x9a   :  { %849 = vmatprep.subr.bf16.mxu1 %v1401_v16  ;;  %v1450_v16 = vld [vmem:[#allocation10 + $0x4] ss:$8 sps:$4 sm:$0xff]  }
  0x9d   :  { %850 = vmatpush1.bf16.msra.mxu1 %v1399_v17  ;;  %v1448_v17 = vld [vmem:[#allocation10] ss:$8 sps:$4 sm:$0xff]  }
  0x9e   :  { %851 = vmatprep.subr.bf16.mxu1 %v1405_v19  ;;  %v1451_v19 = vld [vmem:[#allocation10 + $0xf0] ss:$8 sps:$4 sm:$0xff]  }
  0xa1   :  { %852 = vmatpush2.bf16.msra.mxu1 %v1403_v20  ;;  %v1456_v20 = vld [vmem:[#allocation10 + $0xe4] ss:$8 sps:$4 sm:$0xff]  }
  0xa2   :  { %853 = vmatprep.subr.bf16.mxu1 %v1408_v21  ;;  %v1454_v21 = vld [vmem:[#allocation10 + $0xe0] ss:$8 sps:$4 sm:$0xff]  }
  0xa5   :  { %854 = vmatpush2.bf16.msra.mxu1 %v1406_v22  ;;  %v1459_v22 = vld [vmem:[#allocation10 + $0xd4] ss:$8 sps:$4 sm:$0xff]  }
  0xa6   :  { %855 = vmatprep.subr.bf16.mxu1 %v1411_v23  ;;  %v1457_v23 = vld [vmem:[#allocation10 + $0xd0] ss:$8 sps:$4 sm:$0xff]  }
  0xa9   :  { %856 = vmatpush2.bf16.msra.mxu1 %v1409_v24  ;;  %v1462_v24 = vld [vmem:[#allocation10 + $0xc4] ss:$8 sps:$4 sm:$0xff]  }
  0xaa   :  { %857 = vmatprep.subr.bf16.mxu1 %v1414_v25  ;;  %v1460_v25 = vld [vmem:[#allocation10 + $0xc0] ss:$8 sps:$4 sm:$0xff]  }
  0xad   :  { %858 = vmatpush2.bf16.msra.mxu1 %v1412_v26  ;;  %v1465_v26 = vld [vmem:[#allocation10 + $0xb4] ss:$8 sps:$4 sm:$0xff]  }
  0xae   :  { %859 = vmatprep.subr.bf16.mxu1 %v1417_v27  ;;  %v1463_v27 = vld [vmem:[#allocation10 + $0xb0] ss:$8 sps:$4 sm:$0xff]  }
  0xb1   :  { %860 = vmatpush2.bf16.msra.mxu1 %v1415_v28  ;;  %v1468_v28 = vld [vmem:[#allocation10 + $0xa4] ss:$8 sps:$4 sm:$0xff]  }
  0xb2   :  { %861 = vmatprep.subr.bf16.mxu1 %v1420_v29  ;;  %v1466_v29 = vld [vmem:[#allocation10 + $0xa0] ss:$8 sps:$4 sm:$0xff]  }
  0xb5   :  { %862 = vmatpush2.bf16.msra.mxu1 %v1418_v30  ;;  %v1471_v30 = vld [vmem:[#allocation10 + $0x94] ss:$8 sps:$4 sm:$0xff]  }
  0xb6   :  { %863 = vmatprep.subr.bf16.mxu1 %v1423_v31  ;;  %v1469_v31 = vld [vmem:[#allocation10 + $0x90] ss:$8 sps:$4 sm:$0xff]  }
  0xb9   :  { %864 = vmatpush2.bf16.msra.mxu1 %v1421_v32  ;;  %v1474_v32 = vld [vmem:[#allocation10 + $0x84] ss:$8 sps:$4 sm:$0xff]  }
  0xba   :  { %865 = vmatprep.subr.bf16.mxu1 %v1426_v33  ;;  %v1472_v33 = vld [vmem:[#allocation10 + $0x80] ss:$8 sps:$4 sm:$0xff]  }
  0xbd   :  { %866 = vmatpush2.bf16.msra.mxu1 %v1424_v34 }
 0x120   :  { %v342_v43 = vpop.f32.mrf.mxu1 }
 0x121   :  { %v343_v44 = vadd.f32 %v342_v43, %v131_v41  ;;  %v467_v41 = vrot.slane %v462_v39, %v1679_v38 }
 0x122   :  { %v344_v45 = vpop.f32.mrf.mxu1 }
 0x123   :  { %v345_v46 = vadd.f32 %v344_v45, %v135_v42  ;;  %v390_v47 = vmax.f32 %v343_v44, 0.0  ;;  %v471_v42 = vrot.slane %v462_v39, %v1681_v40 }
 0x124   :  { %v346_v48 = vpop.f32.mrf.mxu1 }
 0x125   :  { %v391_v49 = vmax.f32 %v345_v46, 0.0  ;;  %v394_v53 = vpack.c.bf16 %v390_v47, %v390_v47 }
 0x126   :  { %v347_v50 = vpop.f32.mrf.mxu1 }
 0x127   :  { %v395_v51 = vpack.c.bf16 %v391_v49, %v391_v49 }
 0x129   :  { %826 = vmatprep.mubr.bf16.mxu0 %v395_v51 }
 0x12a   :  { %827 = vmatmul.mubr.bf16.vlgmr.msra.gmra.mxu0 %v394_v53 }
 0x12b   :  { %1085 = vmatpush1.bf16.msra.mxu0 %v1427_v52 }
 0x12c   :  { %1086 = vmatprep.subr.bf16.mxu0 %v1432_v54 }
 0x12f   :  { %1087 = vmatpush1.bf16.msra.mxu0 %v1430_v55  ;;  %v912_v55 = vld [vmem:[%s1704_s6] sm:$0x3] }
 0x130   :  { %1088 = vmatprep.subr.bf16.mxu0 %v1435_v56  ;;  %v917_v56 = vrot.slane %v912_v55, %v1679_v38 }
 0x133   :  { %1089 = vmatpush1.bf16.msra.mxu0 %v1433_v57  ;;  %v921_v57 = vrot.slane %v912_v55, %v1681_v40 }
 0x134   :  { %1090 = vmatprep.subr.bf16.mxu0 %v1438_v58 }
 0x137   :  { %1091 = vmatpush1.bf16.msra.mxu0 %v1436_v59 }
 0x138   :  { %1092 = vmatprep.subr.bf16.mxu0 %v1441_v60 }
 0x13b   :  { %1093 = vmatpush1.bf16.msra.mxu0 %v1439_v61 }
 0x13c   :  { %1094 = vmatprep.subr.bf16.mxu0 %v1444_v62 }
 0x13f   :  { %1095 = vmatpush1.bf16.msra.mxu0 %v1442_v1 }
 0x140   :  { %v383_v4 = vpop.f32.mrf.mxu1  ;;  %1096 = vmatprep.subr.bf16.mxu0 %v1447_v14 }
 0x141   :  { %v384_v5 = vadd.f32 %v383_v4, %v139_v2 }
 0x142   :  { %v385_v6 = vpop.f32.mrf.mxu1 }
 0x143   :  { %v386_v7 = vadd.f32 %v385_v6, %v143_v3  ;;  %v392_v8 = vmax.f32 %v384_v5, 0.0  ;;  %1097 = vmatpush1.bf16.msra.mxu0 %v1445_v15 }
 0x144   :  { %v387_v9 = vpop.f32.mrf.mxu1  ;;  %1098 = vmatprep.subr.bf16.mxu0 %v1450_v16 }
 0x145   :  { %v393_v10 = vmax.f32 %v386_v7, 0.0  ;;  %v396_v13 = vpack.c.bf16 %v392_v8, %v392_v8 }
 0x146   :  { %v388_v11 = vpop.f32.mrf.mxu1 }
 0x147   :  { %v397_v12 = vpack.c.bf16 %v393_v10, %v393_v10  ;;  %1099 = vmatpush1.bf16.msra.mxu0 %v1448_v17 }
 0x148   :  { %1100 = vmatprep.subr.bf16.mxu0 %v1453_v18 }
 0x149   :  { %867 = vmatprep.mubr.bf16.mxu1 %v397_v12 }
 0x14a   :  { %868 = vmatmul.mubr.bf16.vlgmr.msra.gmra.mxu1 %v396_v13 }
 0x14b   :  { %1101 = vmatpush2.bf16.msra.mxu0 %v1451_v19 }
 0x14c   :  { %1102 = vmatprep.subr.bf16.mxu0 %v1456_v20 }
 0x14f   :  { %1103 = vmatpush2.bf16.msra.mxu0 %v1454_v21 }
 0x150   :  { %1104 = vmatprep.subr.bf16.mxu0 %v1459_v22 }
 0x153   :  { %1105 = vmatpush2.bf16.msra.mxu0 %v1457_v23 }
 0x154   :  { %1106 = vmatprep.subr.bf16.mxu0 %v1462_v24 }
 0x157   :  { %1107 = vmatpush2.bf16.msra.mxu0 %v1460_v25 }
 0x158   :  { %1108 = vmatprep.subr.bf16.mxu0 %v1465_v26 }
 0x15b   :  { %1109 = vmatpush2.bf16.msra.mxu0 %v1463_v27 }
 0x15c   :  { %1110 = vmatprep.subr.bf16.mxu0 %v1468_v28 }
 0x15f   :  { %1111 = vmatpush2.bf16.msra.mxu0 %v1466_v29 }
 0x160   :  { %1112 = vmatprep.subr.bf16.mxu0 %v1471_v30 }
 0x163   :  { %1113 = vmatpush2.bf16.msra.mxu0 %v1469_v31 }
 0x164   :  { %1114 = vmatprep.subr.bf16.mxu0 %v1474_v32 }
 0x167   :  { %1115 = vmatpush2.bf16.msra.mxu0 %v1472_v33 }
 0x1ea   :  { %v828_v34 = vpop.f32.mrf.mxu0 }
 0x1eb   :  { %v829_v43 = vadd.f32 %v828_v34, %v467_v41 }
 0x1ec   :  { %v830_v35 = vpop.f32.mrf.mxu0 }
 0x1ed   :  { %v831_v45 = vadd.f32 %v830_v35, %v471_v42 }
 0x1ee   :  { %v832_v36 = vpop.f32.mrf.mxu0 }
 0x1f0   :  { %v833_v37 = vpop.f32.mrf.mxu0 }
 0x20a   :  { %v869_v44 = vpop.f32.mrf.mxu1 }
 0x20b   :  { %v870_v46 = vadd.f32 %v869_v44, %v829_v43 }
 0x20c   :  { %v871_v47 = vpop.f32.mrf.mxu1 }
 0x20d   :  { %v872_v48 = vadd.f32 %v871_v47, %v831_v45  ;;  %v876_v49 = vmax.f32 %v870_v46, 0.0 }
 0x20e   :  { %v873_v50 = vpop.f32.mrf.mxu1 }
 0x20f   :  { %v877_v51 = vmax.f32 %v872_v48, 0.0  ;;  %v878_v54 = vpack.c.bf16 %v876_v49, %v876_v49 }
 0x210   :  { %v874_v52 = vpop.f32.mrf.mxu1 }
 0x211   :  { %v879_v53 = vpack.c.bf16 %v877_v51, %v877_v51 }
 0x213   :  { %1116 = vmatprep.mubr.bf16.mxu0 %v879_v53 }
 0x214   :  { %1117 = vmatmul.mubr.bf16.vlgmr.msra.gmra.mxu0 %v878_v54 }
 0x2d4   :  { %v1118_v58 = vpop.f32.mrf.mxu0 }
 0x2d5   :  { %v1119_v59 = vadd.f32 %v1118_v58, %v917_v56 }
 0x2d6   :  { %v1120_v60 = vpop.f32.mrf.mxu0 }
 0x2d7   :  { %1125 = vst [vmem:[#allocation11] sm:$0xff] %v1119_v59  ;;  %v1121_v61 = vadd.f32 %v1120_v60, %v921_v57 }
 0x2d8   :  { %v1122_v62 = vpop.f32.mrf.mxu0 }
 0x2d9   :  { %1126 = vst [vmem:[#allocation11 + $0x8] sm:$0xff] %v1121_v61 }
 0x2da   :  { %v1123_v63 = vpop.f32.mrf.mxu0 }
 0x2db   :  { %1586 = shalt.err (!%p1583_p1)
}
 0x2dc   :  { %1136 = dma.vmem_to_hbm [thread:$0]  %s1134_s29, 256, %s1705_s7, [#allocation4]  }
 0x2dd   :  { %1601 = dma.done.wait [#allocation4], 256  }
 0x2de   :  { %1602 = vsyncadd [#allocation4], 4294967040 }
 0x2df   :  { %1140 = vsyncpa [#allocation3], 1 }
 0x2e0   :  { %1141 = vsyncpa [#allocation6], 1 }
 0x2e1   :  { %1142 = vsyncpa [#allocation9], 1 }
 0x2e2   :  { %1143 = vsyncpa [#allocation4], 1 }

</bundles_post_ra>
